<compile_context>
chip_gen: v7x
topology: tpu7x:2x2x1
jax: 0.10.0
libtpu: 0.0.40
codegen_flags: <defaults>
</compile_context>

<pallas_src>
import jax
import jax.numpy as jnp
from jax import lax
from jax.experimental import pallas as pl
from jax.experimental.pallas import tpu as pltpu


def alloy_mlp_kernel(x_ref, w1_ref, b1_ref, w2_ref, b2_ref, w3_ref, b3_ref, o_ref):
    x = x_ref[...]                                                    # [TB, F]
    # layer1 + ReLU: contract over F; result is lane-dense [64, TB]  (MXU)
    h1 = lax.dot_general(w1_ref[...], x,
                         dimension_numbers=(((1,), (1,)), ((), ())),
                         preferred_element_type=jnp.float32)          # [64, TB]
    h1 = jnp.maximum(h1 + b1_ref[...], 0.0)
    # layer2 + ReLU  (MXU)
    h2 = jnp.dot(w2_ref[...], h1, preferred_element_type=jnp.float32)  # [32, TB]
    h2 = jnp.maximum(h2 + b2_ref[...], 0.0)
    # layer3 on the MXU as a [1,32] @ [32,TB] matmul (MXU has slack; keeps the
    # VPU/XLU slots free and the output tile lane-dense).
    out = jnp.dot(w3_ref[...], h2, preferred_element_type=jnp.float32)  # [1, TB]
    o_ref[...] = (out + b3_ref[...]).astype(o_ref.dtype)


def _round_up(n, m):
    return ((n + m - 1) // m) * m


def _pick_tile(b_pad, tile_b_target):
    """Largest multiple of 128 that divides b_pad, <= target, leaving >=2 grid
    steps when b_pad allows (so both v7x TensorCores get work)."""
    units = b_pad // 128
    target_units = max(1, min(tile_b_target // 128, units))
    if units >= 2:
        target_units = max(1, min(target_units, units // 2))
    best = 1
    for d in range(1, target_units + 1):
        if units % d == 0:
            best = d
    return best * 128


def alloy_nn_forward(x, params, tile_b=8192, use_bf16_inputs=False):
    """x: [B, input_size] float32; params: w1[64,F], b1[64,1], w2[32,64],
    b2[32,1], w3[1,32], b3[1,1]."""
    B, F = x.shape
    w1, b1 = params["w1"], params["b1"]
    w2, b2 = params["w2"], params["b2"]
    w3, b3 = params["w3"], params["b3"]

    # Pad batch only to a multiple of 128 lanes (cheap jnp.pad of rows), then
    # pick a tile that divides B_pad exactly -> no per-tile padding waste.
    B_pad = _round_up(B, 128)
    tile_b_eff = _pick_tile(B_pad, tile_b)
    grid = (B_pad // tile_b_eff,)

    x_in = jnp.pad(x, ((0, B_pad - B), (0, 0)))
    if use_bf16_inputs:
        # Halves x DMA bytes and doubles MXU rate on v6e/v7x; f32 accumulation
        # is preserved via preferred_element_type.  Loosen tolerances to ~1e-3.
        x_in = x_in.astype(jnp.bfloat16)
        w1 = w1.astype(jnp.bfloat16)
        w2 = w2.astype(jnp.bfloat16)

    def resident(shape):
        # Weights / biases: same block every grid step -> DMA'd once, VMEM-resident.
        return pl.BlockSpec(shape, lambda i: (0, 0))

    out_t = pl.pallas_call(
        alloy_mlp_kernel,
        out_shape=jax.ShapeDtypeStruct((1, B_pad), jnp.float32),
        grid_spec=pltpu.PrefetchScalarGridSpec(
            num_scalar_prefetch=0,
            grid=grid,
            in_specs=[
                pl.BlockSpec((tile_b_eff, F), lambda i: (i, 0)),   # x tile, native layout
                resident(w1.shape), resident(b1.shape),
                resident(w2.shape), resident(b2.shape),
                resident(w3.shape), resident(b3.shape),
            ],
            out_specs=pl.BlockSpec((1, tile_b_eff), lambda i: (0, i)),
        ),
        compiler_params=pltpu.CompilerParams(
            dimension_semantics=("parallel",),
        ),
    )(x_in, w1, b1, w2, b2, w3, b3)

    # Padded batch columns carry relu(b1)-derived garbage; slice them off.
    return out_t[:, :B].T  # [B, 1]


def init_params(key, input_size):
    """Deterministic init mimicking nn.Linear's U(-1/sqrt(fan_in), 1/sqrt(fan_in)).

    Weights stored [out, in] (PyTorch layout), biases [out, 1] so they
    broadcast over the lane (batch) axis inside the kernel.
    """
    def linear(key, fan_in, fan_out):
        kw, kb = jax.random.split(key)
        bound = 1.0 / jnp.sqrt(float(fan_in))
        w = jax.random.uniform(kw, (fan_out, fan_in), jnp.float32, -bound, bound)
        b = jax.random.uniform(kb, (fan_out, 1), jnp.float32, -bound, bound)
        return w, b

    k1, k2, k3 = jax.random.split(key, 3)
    w1, b1 = linear(k1, input_size, 64)
    w2, b2 = linear(k2, 64, 32)
    w3, b3 = linear(k3, 32, 1)
    return {"w1": w1, "b1": b1, "w2": w2, "b2": b2, "w3": w3, "b3": b3}


def reference_forward(x, p):
    h1 = jnp.maximum(x @ p["w1"].T + p["b1"].T, 0.0)
    h2 = jnp.maximum(h1 @ p["w2"].T + p["b2"].T, 0.0)
    return h2 @ p["w3"].T + p["b3"].T


if __name__ == "__main__":
    key = jax.random.PRNGKey(0)
    k_params, k_x1, k_x2 = jax.random.split(key, 3)

    input_size = 16  # e.g. number of alloy composition features
    params = init_params(k_params, input_size)

    # Small primary test (single tile).
    x_small = jax.random.normal(k_x1, (8, input_size), jnp.float32)
    out_small = jax.block_until_ready(alloy_nn_forward(x_small, params))
    ref_small = reference_forward(x_small, params)
    assert out_small.shape == (8, 1), out_small.shape
    assert jnp.allclose(out_small, ref_small, atol=1e-4, rtol=1e-4), "mismatch (small)"

    # Multi-tile test: non-128-multiple batch exercises padding + >1 grid step.
    x_big = jax.random.normal(k_x2, (300, input_size), jnp.float32)
    out_big = jax.block_until_ready(alloy_nn_forward(x_big, params, tile_b=256))
    ref_big = reference_forward(x_big, params)
    assert out_big.shape == (300, 1), out_big.shape
    assert jnp.allclose(out_big, ref_big, atol=1e-4, rtol=1e-4), "mismatch (multi-tile)"

    print("KERNEL_OK")
</pallas_src>

<mosaic_0001>
module attributes {stable_mosaic.version = 11 : i64} {
  func.func @alloy_mlp_kernel(%arg0: i32, %arg1: memref<128x16xf32, #tpu.memory_space<vmem>>, %arg2: memref<64x16xf32, #tpu.memory_space<vmem>>, %arg3: memref<64x1xf32, #tpu.memory_space<vmem>>, %arg4: memref<32x64xf32, #tpu.memory_space<vmem>>, %arg5: memref<32x1xf32, #tpu.memory_space<vmem>>, %arg6: memref<1x32xf32, #tpu.memory_space<vmem>>, %arg7: memref<1x1xf32, #tpu.memory_space<vmem>>, %arg8: memref<1x128xf32, #tpu.memory_space<vmem>>) attributes {dimension_semantics = [#tpu.dimension_semantics<parallel>], iteration_bounds = array<i64: 1>, scalar_prefetch = 0 : i64, scratch_operands = 0 : i64, tpu.core_type = #tpu.core_type<tc>, window_params = [{transform_indices = @transform_0, window_bounds = array<i64: 128, 16>}, {pipeline_mode = #tpu.pipeline_mode<synchronous>, transform_indices = @transform_1, window_bounds = array<i64: 64, 16>}, {pipeline_mode = #tpu.pipeline_mode<synchronous>, transform_indices = @transform_2, window_bounds = array<i64: 64, 1>}, {pipeline_mode = #tpu.pipeline_mode<synchronous>, transform_indices = @transform_3, window_bounds = array<i64: 32, 64>}, {pipeline_mode = #tpu.pipeline_mode<synchronous>, transform_indices = @transform_4, window_bounds = array<i64: 32, 1>}, {pipeline_mode = #tpu.pipeline_mode<synchronous>, transform_indices = @transform_5, window_bounds = array<i64: 1, 32>}, {pipeline_mode = #tpu.pipeline_mode<synchronous>, transform_indices = @transform_6, window_bounds = array<i64: 1, 1>}, {transform_indices = @transform_7, window_bounds = array<i64: 1, 128>}]} {
    %c0 = arith.constant 0 : index
    %c0_0 = arith.constant 0 : index
    %0 = vector.load %arg1[%c0, %c0_0] : memref<128x16xf32, #tpu.memory_space<vmem>>, vector<128x16xf32>
    %c0_1 = arith.constant 0 : index
    %c0_2 = arith.constant 0 : index
    %1 = vector.load %arg2[%c0_1, %c0_2] : memref<64x16xf32, #tpu.memory_space<vmem>>, vector<64x16xf32>
    %cst = arith.constant dense<0.000000e+00> : vector<64x128xf32>
    %2 = tpu.matmul %1, %0, %cst {dimension_numbers = #tpu.dot_dimension_numbers<[1], [1], [0], [0], [0, 0, 1, 0], [], []>} : vector<64x16xf32>, vector<128x16xf32>, vector<64x128xf32> -> vector<64x128xf32>
    %c0_3 = arith.constant 0 : index
    %c0_4 = arith.constant 0 : index
    %3 = vector.load %arg3[%c0_3, %c0_4] : memref<64x1xf32, #tpu.memory_space<vmem>>, vector<64x1xf32>
    %4 = vector.broadcast %3 : vector<64x1xf32> to vector<64x128xf32>
    %5 = arith.addf %2, %4 : vector<64x128xf32>
    %cst_5 = arith.constant 0.000000e+00 : f32
    %6 = vector.broadcast %cst_5 : f32 to vector<64x128xf32>
    %7 = arith.maximumf %5, %6 : vector<64x128xf32>
    %c0_6 = arith.constant 0 : index
    %c0_7 = arith.constant 0 : index
    %8 = vector.load %arg4[%c0_6, %c0_7] : memref<32x64xf32, #tpu.memory_space<vmem>>, vector<32x64xf32>
    %cst_8 = arith.constant dense<0.000000e+00> : vector<32x128xf32>
    %9 = tpu.matmul %8, %7, %cst_8 {dimension_numbers = #tpu.dot_dimension_numbers<[1], [0], [0], [1], [0, 0, 1, 1], [], []>} : vector<32x64xf32>, vector<64x128xf32>, vector<32x128xf32> -> vector<32x128xf32>
    %c0_9 = arith.constant 0 : index
    %c0_10 = arith.constant 0 : index
    %10 = vector.load %arg5[%c0_9, %c0_10] : memref<32x1xf32, #tpu.memory_space<vmem>>, vector<32x1xf32>
    %11 = vector.broadcast %10 : vector<32x1xf32> to vector<32x128xf32>
    %12 = arith.addf %9, %11 : vector<32x128xf32>
    %cst_11 = arith.constant 0.000000e+00 : f32
    %13 = vector.broadcast %cst_11 : f32 to vector<32x128xf32>
    %14 = arith.maximumf %12, %13 : vector<32x128xf32>
    %c0_12 = arith.constant 0 : index
    %c0_13 = arith.constant 0 : index
    %15 = vector.load %arg6[%c0_12, %c0_13] : memref<1x32xf32, #tpu.memory_space<vmem>>, vector<1x32xf32>
    %cst_14 = arith.constant dense<0.000000e+00> : vector<1x128xf32>
    %16 = tpu.matmul %15, %14, %cst_14 {dimension_numbers = #tpu.dot_dimension_numbers<[1], [0], [0], [1], [0, 0, 1, 1], [], []>} : vector<1x32xf32>, vector<32x128xf32>, vector<1x128xf32> -> vector<1x128xf32>
    %c0_15 = arith.constant 0 : index
    %c0_16 = arith.constant 0 : index
    %17 = vector.load %arg7[%c0_15, %c0_16] : memref<1x1xf32, #tpu.memory_space<vmem>>, vector<1x1xf32>
    %18 = vector.broadcast %17 : vector<1x1xf32> to vector<1x128xf32>
    %19 = arith.addf %16, %18 : vector<1x128xf32>
    %c0_17 = arith.constant 0 : index
    %c0_18 = arith.constant 0 : index
    %20 = vector.load %arg8[%c0_17, %c0_18] : memref<1x128xf32, #tpu.memory_space<vmem>>, vector<1x128xf32>
    tpu.vector_store %arg8[%c0_17, %c0_18], %19 {strides = array<i32>} : memref<1x128xf32, #tpu.memory_space<vmem>>, vector<1x128xf32>,
    return
  }
  func.func @transform_0(%arg0: i32) -> (i32, i32) {
    %c0_i32 = arith.constant 0 : i32
    %c0_i32_0 = arith.constant 0 : i32
    return %arg0, %c0_i32 : i32, i32
  }
  func.func @transform_1(%arg0: i32) -> (i32, i32) {
    %c0_i32 = arith.constant 0 : i32
    %c0_i32_0 = arith.constant 0 : i32
    %c0_i32_1 = arith.constant 0 : i32
    return %c0_i32, %c0_i32_0 : i32, i32
  }
  func.func @transform_2(%arg0: i32) -> (i32, i32) {
    %c0_i32 = arith.constant 0 : i32
    %c0_i32_0 = arith.constant 0 : i32
    %c0_i32_1 = arith.constant 0 : i32
    return %c0_i32, %c0_i32_0 : i32, i32
  }
  func.func @transform_3(%arg0: i32) -> (i32, i32) {
    %c0_i32 = arith.constant 0 : i32
    %c0_i32_0 = arith.constant 0 : i32
    %c0_i32_1 = arith.constant 0 : i32
    return %c0_i32, %c0_i32_0 : i32, i32
  }
  func.func @transform_4(%arg0: i32) -> (i32, i32) {
    %c0_i32 = arith.constant 0 : i32
    %c0_i32_0 = arith.constant 0 : i32
    %c0_i32_1 = arith.constant 0 : i32
    return %c0_i32, %c0_i32_0 : i32, i32
  }
  func.func @transform_5(%arg0: i32) -> (i32, i32) {
    %c0_i32 = arith.constant 0 : i32
    %c0_i32_0 = arith.constant 0 : i32
    %c0_i32_1 = arith.constant 0 : i32
    return %c0_i32, %c0_i32_0 : i32, i32
  }
  func.func @transform_6(%arg0: i32) -> (i32, i32) {
    %c0_i32 = arith.constant 0 : i32
    %c0_i32_0 = arith.constant 0 : i32
    %c0_i32_1 = arith.constant 0 : i32
    return %c0_i32, %c0_i32_0 : i32, i32
  }
  func.func @transform_7(%arg0: i32) -> (i32, i32) {
    %c0_i32 = arith.constant 0 : i32
    %c0_i32_0 = arith.constant 0 : i32
    return %c0_i32, %arg0 : i32, i32
  }
}

</mosaic_0001>

<bundles_post_ra>
// kernel: tpu_custom_call.1
= control target key start
LH: loop header
LB: loop body
LE: loop exit
PB: predicated region body
PF: predicated region fallthrough
CT: control target
= control target key end

     0   :  { %s998_s0 = inlined_call_operand.vmem [shape: f32[128,16], index: 0, kind: input, shape index: {}]   ;;  %s999_s1 = inlined_call_operand.vmem [shape: f32[64,16], index: 1, kind: input, shape index: {}]   ;;  %s1000_s2 = inlined_call_operand.vmem [shape: f32[64,1], index: 2, kind: input, shape index: {}]   ;;  %s1001_s3 = inlined_call_operand.vmem [shape: f32[32,64], index: 3, kind: input, shape index: {}]   ;;  %s1002_s4 = inlined_call_operand.vmem [shape: f32[32,1], index: 4, kind: input, shape index: {}]   ;;  %s1003_s5 = inlined_call_operand.vmem [shape: f32[1,32], index: 5, kind: input, shape index: {}]   ;;  %s1004_s6 = inlined_call_operand.<no memory space> [shape: f32[1,1], index: 6, kind: input, shape index: {}]   ;;  %s1005_s7 = inlined_call_operand.hbm [shape: f32[1,128], index: 7, kind: output, shape index: {}]  }
   0x1   :  { %v12_v0 = vstv %s1004_s6 }
   0x2   :  { %13 = vst [vmem:[#allocation2] sm:$0x1] %v12_v0 }
   0x3   :  { %v29_v1 = vld [vmem:[%s998_s0] sm:$0xff]  ;;  %v30_v2 = vld [vmem:[%s998_s0 + $0x8] sm:$0xff]  ;;  %vm101_vm0 = vcmask 130048   ;;  %v31_v3 = vld [vmem:[%s998_s0 + $0x10] sm:$0xff]  ;;  %v765_v7 = vmov 0  }
   0x4   :  { %v664_v4 = vpack.c.bf16 %v30_v2, %v29_v1  ;;  %vm824_vm1 = vmpackc.low %vm101_vm0, %vm101_vm0  ;;  %v32_v6 = vld [vmem:[%s998_s0 + $0x18] sm:$0xff]  ;;  %739 = vset.pattern.permute.xlu0 %v765_v7  ;;  %740 = vset.pattern.permute.xlu1 %v765_v7  ;;  %v45_v9 = vld [vmem:[%s999_s1] sm:$0xff] }
   0x5   :  { %v670_v8 = vpack.c.bf16 %v32_v6, %v31_v3  ;;  %v33_v10 = vld [vmem:[%s998_s0 + $0x20] sm:$0xff]  ;;  %v34_v11 = vld [vmem:[%s998_s0 + $0x28] sm:$0xff]  ;;  %619 = vmatprep.mubr.msk.f32.mxu0 %vm101_vm0, %v45_v9  ;;  %v55_v14 = vld [vmem:[%s1000_s2 + $0x10] sm:$0xff] }
   0x6   :  { %666 = vmatprep.subr.msk.bf16.mxu0 %vm824_vm1, %v664_v4  ;;  %v53_v12 = vld [vmem:[%s1000_s2] sm:$0xff]  ;;  %v676_v13 = vpack.c.bf16 %v34_v11, %v33_v10  ;;  %v54_v15 = vld [vmem:[%s1000_s2 + $0x8] sm:$0xff]  ;;  %73 = vperm.xlu1 %740, %v55_v14   ;;  %v56_v16 = vld [vmem:[%s1000_s2 + $0x18] sm:$0xff] }
   0x7   :  { %669 = vmatpush3.bf16.xpose.msk.msra.mxu0 %vm824_vm1, %v664_v4  ;;  %63 = vperm.xlu0 %739, %v53_v12  }
   0x8   :  { %672 = vmatprep.subr.msk.bf16.mxu0 %vm824_vm1, %v670_v8 }
   0xf   :  { %675 = vmatpush3.bf16.xpose.msk.msra.mxu0 %vm824_vm1, %v670_v8 }
  0x10   :  { %14 = vsyncpa [#allocation4], 0  ;;  %678 = vmatprep.subr.msk.bf16.mxu0 %vm824_vm1, %v676_v13  ;;  %68 = vperm.xlu0 %739, %v54_v15   ;;  %v35_v17 = vld [vmem:[%s998_s0 + $0x30] sm:$0xff]  ;;  %v36_v18 = vld [vmem:[%s998_s0 + $0x38] sm:$0xff]  ;;  %vm315_vm2 = vcmask 523264   ;;  %vm767_vm3 = vmmov 0  }
  0x11   :  { %v57_v19 = vld [vmem:[%s1000_s2 + $0x20] sm:$0xff]  ;;  %78 = vperm.xlu1 %740, %v56_v16   ;;  %v58_v20 = vld [vmem:[%s1000_s2 + $0x28] sm:$0xff]  ;;  %v682_v21 = vpack.c.bf16 %v36_v18, %v35_v17  ;;  %v59_v22 = vld [vmem:[%s1000_s2 + $0x30] sm:$0xff]  ;;  %vm428_vm4 = vcmask 261120   ;;  %s769_s29 = smov [#allocation3]  }
  0x12   :  { %v60_v23 = vld [vmem:[%s1000_s2 + $0x38] sm:$0xff]  ;;  %v37_v24 = vld [vmem:[%s998_s0 + $0x40] sm:$0xff]  ;;  %v38_v25 = vld [vmem:[%s998_s0 + $0x48] sm:$0xff]  ;;  %s509_s30 = sshll.u32 %s769_s29, 4  ;;  %s510_s30 = int_to_ptr.vmem [resolvable:$true] %s509_s30 }
  0x13   :  { %v291_v26 = vld [vmem:[%s1002_s4] sm:$0xff]  ;;  %v292_v27 = vld [vmem:[%s1002_s4 + $0x8] sm:$0xff]  ;;  %v688_v28 = vpack.c.bf16 %v38_v25, %v37_v24  ;;  %v293_v29 = vld [vmem:[%s1002_s4 + $0x10] sm:$0xff]  ;;  %v766_v24 = vmov 0.0|0.0   ;;  %v768_v25 = vmov 0.0   ;;  %s741_s8 = scalar_lea.vmem %s510_s30, 16  ;;  %p746_p1 = scmp.lt.s32.totalorder %s510_s30, %s510_s30 }
  0x14   :  { %83 = vperm.xlu0 %739, %v57_v19   ;;  %v294_v30 = vld [vmem:[%s1002_s4 + $0x18] sm:$0xff]  ;;  %v39_v31 = vld [vmem:[%s998_s0 + $0x50] sm:$0xff]  ;;  %v418_v33 = vld [vmem:[#allocation2] sm:$0x1]  ;;  %p742_p0 = scmp.ne.s32.totalorder %s510_s30, %s741_s8  ;;  %s745_s6 = scalar_lea.vmem %s510_s30, 32 }
  0x15   :  { %88 = vperm.xlu1 %740, %v58_v20   ;;  %v40_v32 = vld [vmem:[%s998_s0 + $0x58] sm:$0xff]  ;;  %v41_v35 = vld [vmem:[%s998_s0 + $0x60] sm:$0xff]  ;;  %v42_v36 = vld [vmem:[%s998_s0 + $0x68] sm:$0xff]  ;;  %p747_p2 = scmp.lt.s32.totalorder %s745_s6, %s741_s8 }
  0x16   :  { %v694_v34 = vpack.c.bf16 %v40_v32, %v39_v31  ;;  %v700_v37 = vpack.c.bf16 %v42_v36, %v41_v35  ;;  %v43_v38 = vld [vmem:[%s998_s0 + $0x70] sm:$0xff]  ;;  %v44_v39 = vld [vmem:[%s998_s0 + $0x78] sm:$0xff]  ;;  %v46_v41 = vld [vmem:[%s999_s1 + $0x8] sm:$0xff] }
  0x17   :  { %681 = vmatpush3.bf16.xpose.msk.msra.mxu0 %vm824_vm1, %v676_v13  ;;  %v706_v40 = vpack.c.bf16 %v44_v39, %v43_v38  ;;  %v47_v42 = vld [vmem:[%s999_s1 + $0x10] sm:$0xff]  ;;  %v48_v43 = vld [vmem:[%s999_s1 + $0x18] sm:$0xff]  ;;  %v49_v44 = vld [vmem:[%s999_s1 + $0x20] sm:$0xff]  ;;  %p748_p3 = por %p747_p2, %p746_p1 }
  0x18   :  { %684 = vmatprep.subr.msk.bf16.mxu0 %vm824_vm1, %v682_v21  ;;  %93 = vperm.xlu0 %739, %v59_v22   ;;  %v50_v45 = vld [vmem:[%s999_s1 + $0x28] sm:$0xff]  ;;  %v51_v46 = vld [vmem:[%s999_s1 + $0x30] sm:$0xff]  ;;  %v52_v47 = vld [vmem:[%s999_s1 + $0x38] sm:$0xff] }
  0x19   :  { %98 = vperm.xlu1 %740, %v60_v23   ;;  %v287_v48 = vld [vmem:[%s1001_s3] sm:$0xff]  ;;  %v289_v22 = vld [vmem:[%s1001_s3 + $0x10] sm:$0xff]  ;;  %v290_v23 = vld [vmem:[%s1001_s3 + $0x18] sm:$0xff]  ;;  %p749_p4 = pnand %p748_p3, %p742_p0 }
  0x1a   :  { %647 = vmatprep.mubr.msk.f32.mxu1 %vm315_vm2, %v287_v48 }
  0x1c   :  { %297 = vperm.xlu0 %739, %v291_v26  }
  0x1d   :  { %302 = vperm.xlu1 %740, %v292_v27  }
  0x1f   :  { %687 = vmatpush3.bf16.xpose.msk.msra.mxu0 %vm824_vm1, %v682_v21  ;;  %v288_v21 = vld [vmem:[%s1001_s3 + $0x8] sm:$0xff] }
  0x20   :  { %690 = vmatprep.subr.msk.bf16.mxu0 %vm824_vm1, %v688_v28  ;;  %307 = vperm.xlu0 %739, %v293_v29  }
  0x21   :  { %312 = vperm.xlu1 %740, %v294_v30  }
  0x24   :  { %421 = vperm.xlu0 %739, %v418_v33  }
  0x27   :  { %693 = vmatpush3.bf16.xpose.msk.msra.mxu0 %vm824_vm1, %v688_v28 }
  0x28   :  { %696 = vmatprep.subr.msk.bf16.mxu0 %vm824_vm1, %v694_v34 }
  0x2f   :  { %699 = vmatpush3.bf16.xpose.msk.msra.mxu0 %vm824_vm1, %v694_v34 }
  0x30   :  { %702 = vmatprep.subr.msk.bf16.mxu0 %vm824_vm1, %v700_v37 }
  0x37   :  { %705 = vmatpush3.bf16.xpose.msk.msra.mxu0 %vm824_vm1, %v700_v37 }
  0x38   :  { %708 = vmatprep.subr.msk.bf16.mxu0 %vm824_vm1, %v706_v40 }
  0x3f   :  { %711 = vmatpush3.bf16.xpose.msk.msra.mxu0 %vm824_vm1, %v706_v40 }
  0x46   :  { %620 = vmatmul.mubr.msk.f32.vlgmr.msra.gmra.mrb[0].mxu0 %vm101_vm0, %v46_v41 }
  0x47   :  { %622 = vmatprep.mubr.msk.f32.mxu0 %vm101_vm0, %v47_v42 }
  0x4a   :  { %623 = vmatmul.mubr.msk.f32.gmra.mrb[2].mxu0 %vm101_vm0, %v48_v43 }
  0x4b   :  { %625 = vmatprep.mubr.msk.f32.mxu0 %vm101_vm0, %v49_v44  ;;  %v417_v44 = vld [vmem:[%s1003_s5] sm:$0x1] }
  0x4e   :  { %626 = vmatmul.mubr.msk.f32.gmra.mrb[4].mxu0 %vm101_vm0, %v50_v45  ;;  %v424_v45 = vlaneseq }
  0x4f   :  { %628 = vmatprep.mubr.msk.f32.mxu0 %vm101_vm0, %v51_v46 }
  0x50   :  { %v425_v46 = vshrl.u32 %v424_v45, 7 }
  0x52   :  { %629 = vmatmul.mubr.msk.f32.gmra.mrb[6].mxu0 %vm101_vm0, %v52_v47  ;;  %v426_v47 = vsub.s32 0, %v425_v46 }
  0x85   :  { %v74_v50 = vpop.permute.xlu1 %73 }
  0x86   :  { %v64_v49 = vpop.permute.xlu0 %63 }
  0x8f   :  { %v69_v51 = vpop.permute.xlu0 %68 }
  0x90   :  { %v79_v52 = vpop.permute.xlu1 %78 }
  0x93   :  { %v84_v1 = vpop.permute.xlu0 %83 }
  0x94   :  { %v89_v62 = vpop.permute.xlu1 %88 }
  0x97   :  { %v94_v13 = vpop.permute.xlu0 %93 }
  0x98   :  { %v99_v10 = vpop.permute.xlu1 %98 }
  0x9b   :  { %v298_v27 = vpop.permute.xlu0 %297 }
  0x9c   :  { %v303_v26 = vpop.permute.xlu1 %302 }
  0x9f   :  { %v308_v36 = vpop.permute.xlu0 %307 }
  0xa0   :  { %v313_v33 = vpop.permute.xlu1 %312 }
  0xa3   :  { %v422_v48 = vpop.permute.xlu0 %421 }
 0x119   :  { %v621_v53 = vpop.f32.mrb[0].mxu0 }
 0x11a   :  { %v246_v54 = vadd.f32 %v621_v53, %v69_v51  ;;  %v240_v55 = vpop.f32.mrb[1].mxu0 }
 0x11b   :  { %v241_v56 = vadd.f32 %v240_v55, %v64_v49  ;;  %v427_v49 = vrot.slane %v422_v48, %v426_v47 }
 0x11c   :  { %v280_v57 = vmax.f32 %v246_v54, 0.0 }
 0x11d   :  { %v279_v58 = vmax.f32 %v241_v56, 0.0  ;;  %v624_v59 = vpop.f32.mrb[2].mxu0 }
 0x11e   :  { %v256_v60 = vadd.f32 %v624_v59, %v79_v52  ;;  %v250_v61 = vpop.f32.mrb[3].mxu0 }
 0x11f   :  { %v251_v63 = vadd.f32 %v250_v61, %v74_v50  ;;  %v712_v0 = vpack.c.bf16 %v280_v57, %v279_v58 }
 0x120   :  { %v282_v2 = vmax.f32 %v256_v60, 0.0 }
 0x121   :  { %v281_v3 = vmax.f32 %v251_v63, 0.0  ;;  %v627_v4 = vpop.f32.mrb[4].mxu0  ;;  %713 = vmatprep.subr.bf16.mxu1 %v712_v0 }
 0x122   :  { %v266_v5 = vadd.f32 %v627_v4, %v89_v62  ;;  %v260_v6 = vpop.f32.mrb[5].mxu0  ;;  %715 = vmatpush3.bf16.msra.mxu1 %v712_v0 }
 0x123   :  { %v716_v7 = vpack.c.bf16 %v282_v2, %v281_v3  ;;  %v261_v8 = vadd.f32 %v260_v6, %v84_v1 }
 0x124   :  { %v284_v9 = vmax.f32 %v266_v5, 0.0 }
 0x125   :  { %v283_v11 = vmax.f32 %v261_v8, 0.0  ;;  %v630_v12 = vpop.f32.mrb[6].mxu0  ;;  %717 = vmatprep.subr.bf16.mxu1 %v716_v7 }
 0x126   :  { %v276_v14 = vadd.f32 %v630_v12, %v99_v10  ;;  %v270_v15 = vpop.f32.mrb[7].mxu0  ;;  %719 = vmatpush3.bf16.msra.mxu1 %v716_v7 }
 0x127   :  { %v720_v16 = vpack.c.bf16 %v284_v9, %v283_v11  ;;  %v271_v17 = vadd.f32 %v270_v15, %v94_v13 }
 0x128   :  { %v286_v18 = vmax.f32 %v276_v14, 0.0 }
 0x129   :  { %v285_v19 = vmax.f32 %v271_v17, 0.0  ;;  %721 = vmatprep.subr.bf16.mxu1 %v720_v16 }
 0x12a   :  { %723 = vmatpush3.bf16.msra.mxu1 %v720_v16 }
 0x12b   :  { %v724_v20 = vpack.c.bf16 %v286_v18, %v285_v19 }
 0x12d   :  { %725 = vmatprep.subr.bf16.mxu1 %v724_v20 }
 0x12e   :  { %727 = vmatpush3.bf16.msra.mxu1 %v724_v20 }
 0x12f   :  { %728 = vmatprep.subr.bf16.mxu1 %v766_v24 }
 0x131   :  { %648 = vmatmul.mubr.msk.f32.vlgmr.msra.gmra.mrb[0].mxu1 %vm315_vm2, %v288_v21 }
 0x132   :  { %650 = vmatprep.mubr.msk.f32.mxu1 %vm315_vm2, %v289_v22 }
 0x135   :  { %651 = vmatmul.mubr.msk.f32.gmra.mrb[2].mxu1 %vm315_vm2, %v290_v23 }
 0x136   :  { %661 = vmatprep.mubr.msk.f32.mxu1 %vm767_vm3, %v768_v25 }
 0x204   :  { %v649_v28 = vpop.f32.mrb[0].mxu1 }
 0x205   :  { %v400_v29 = vadd.f32 %v649_v28, %v303_v26  ;;  %v394_v30 = vpop.f32.mrb[1].mxu1 }
 0x206   :  { %v395_v31 = vadd.f32 %v394_v30, %v298_v27 }
 0x207   :  { %v414_v32 = vmax.f32 %v400_v29, 0.0 }
 0x208   :  { %v413_v34 = vmax.f32 %v395_v31, 0.0  ;;  %v652_v35 = vpop.f32.mrb[2].mxu1 }
 0x209   :  { %v410_v37 = vadd.f32 %v652_v35, %v313_v33  ;;  %v404_v38 = vpop.f32.mrb[3].mxu1 }
 0x20a   :  { %v729_v39 = vpack.c.bf16 %v414_v32, %v413_v34  ;;  %v405_v40 = vadd.f32 %v404_v38, %v308_v36 }
 0x20b   :  { %v416_v41 = vmax.f32 %v410_v37, 0.0 }
 0x20c   :  { %v415_v42 = vmax.f32 %v405_v40, 0.0  ;;  %730 = vmatpush3.bf16.msra.mxu1 %v729_v39 }
 0x20d   :  { %731 = vmatprep.subr.bf16.mxu1 %v766_v24 }
 0x20e   :  { %v732_v43 = vpack.c.bf16 %v416_v41, %v415_v42 }
 0x210   :  { %733 = vmatpush3.bf16.msra.mxu1 %v732_v43 }
 0x213   :  { %662 = vmatmul.mubr.msk.f32.vlgmr.msra.gmra.mrb[4].mxu1 %vm428_vm4, %v417_v44 }
 0x2e6   :  { %v498_v50 = vpop.f32.mrb[4].mxu1 }
 0x2e7   :  { %v499_v51 = vadd.f32 %v498_v50, %v427_v49  ;;  %v663_v52 = vpop.f32.mrb[5].mxu1 }
 0x2e9   :  { %502 = vst [vmem:[#allocation3] sm:$0x1] %v499_v51 }
 0x2ea   :  { %752 = shalt.err (!%p749_p4)
}
 0x2eb   :  { %s753_s10 = scalar_lea.hbm %s1005_s7, 16 }
 0x2ec   :  { %p754_p5 = scmp.ne.s32.totalorder %s1005_s7, %s753_s10  ;;  %p757_p6 = scmp.lt.u32.totalorder %s753_s10, %s1005_s7 }
 0x2ee   :  { %p759_p7 = pnand %p757_p6, %p754_p5 }
 0x2f0   :  { %762 = shalt.err (!%p759_p7)
}
 0x2f1   :  { %512 = dma.vmem_to_hbm [thread:$0]  %s510_s30, 16, %s1005_s7, [#allocation4]  }
 0x2f2   :  { %763 = dma.done.wait [#allocation4], 16  }
 0x2f3   :  { %764 = vsyncadd [#allocation4], 4294967280 }
 0x2f4   :  { %516 = vsyncpa [#allocation4], 1 }

</bundles_post_ra>
